<compile_context>
chip_gen: v5e
topology: v5e:2x2
jax: 0.10.0
libtpu: 0.0.40
codegen_flags: <defaults>
</compile_context>

<pallas_src>
import jax
import jax.numpy as jnp
from jax.experimental import pallas as pl
from jax.experimental.pallas import tpu as pltpu


# ------------------------------ Pallas kernel -------------------------------

def _attack_fwd_kernel(x_ref, w1_ref, b1_ref, w2_ref, b2_ref, o_ref):
    """Fused fc1 -> fc2 -> softmax on one (tm, K) batch tile.

    x:  (tm, K)  f32      w1: (K, H) bf16    b1: (1, H) f32
    w2: (H, C)   bf16     b2: (1, C) f32     o:  (tm, C) f32 (softmax probs)
    """
    # fc1 (no activation, matching the torch forward exactly)
    x_lo = x_ref[...].astype(w1_ref.dtype)
    h = jnp.dot(x_lo, w1_ref[...], preferred_element_type=jnp.float32)
    h = h + b1_ref[...]

    # fc2
    logits = jnp.dot(h.astype(w2_ref.dtype), w2_ref[...],
                     preferred_element_type=jnp.float32)
    logits = logits + b2_ref[...]

    # numerically-stable softmax along the class axis (torch F.softmax dim=1)
    m = jnp.max(logits, axis=-1, keepdims=True)
    e = jnp.exp(logits - m)
    s = jnp.sum(e, axis=-1, keepdims=True)
    o_ref[...] = (e / s).astype(o_ref.dtype)


# ------------------------------- host wrapper -------------------------------

def _round_up(v, m):
    return (v + m - 1) // m * m


def _padded_tile_bytes(rows, cols, itemsize):
    # VMEM tiles are laid out on (8, 128) vreg tiles.
    return _round_up(max(rows, 1), 8) * _round_up(max(cols, 1), 128) * itemsize


def attack_forward(params, x, *, tm=512):
    """Forward pass of AttackModel.  x: (M, input_size) f32 -> (M, 2) f32."""
    M, K = x.shape
    w1, b1, w2, b2 = params["w1"], params["b1"], params["w2"], params["b2"]
    H = w1.shape[1]
    C = w2.shape[1]

    # Batch tile: full array if it fits, otherwise a sublane-aligned tile.
    tm_eff = M if M <= tm else tm
    grid_m = pl.cdiv(M, tm_eff)

    # VMEM budget sized from the actual (padded, double-buffered) tiles.
    vmem_bytes = (
        2 * _padded_tile_bytes(tm_eff, K, 4)        # x tile (double buffered)
        + 2 * _padded_tile_bytes(tm_eff, C, 4)      # out tile
        + 2 * (_padded_tile_bytes(K, H, 2) + _padded_tile_bytes(H, C, 2))
        + 2 * (_padded_tile_bytes(1, H, 4) + _padded_tile_bytes(1, C, 4))
    )
    vmem_bytes = min(2 * vmem_bytes + (8 << 20), 32 << 20)

    cost = pl.CostEstimate(
        flops=2 * M * K * H + 2 * M * H * C,
        transcendentals=M * C,
        bytes_accessed=(x.size * 4 + w1.size * 2 + w2.size * 2
                        + (b1.size + b2.size) * 4 + M * C * 4),
    )

    return pl.pallas_call(
        _attack_fwd_kernel,
        out_shape=jax.ShapeDtypeStruct((M, C), jnp.float32),
        grid=(grid_m,),
        in_specs=[
            pl.BlockSpec((tm_eff, K), lambda i: (i, 0)),   # x: tiled over batch
            pl.BlockSpec((K, H), lambda i: (0, 0)),        # w1: resident
            pl.BlockSpec((1, H), lambda i: (0, 0)),        # b1
            pl.BlockSpec((H, C), lambda i: (0, 0)),        # w2
            pl.BlockSpec((1, C), lambda i: (0, 0)),        # b2
        ],
        out_specs=pl.BlockSpec((tm_eff, C), lambda i: (i, 0)),
        compiler_params=pltpu.CompilerParams(
            dimension_semantics=("parallel",),
            vmem_limit_bytes=int(vmem_bytes)),
        cost_estimate=cost,
    )(x, w1, b1, w2, b2)


# ------------------------------ parameter prep ------------------------------

def prepare_params(fc1_w, fc1_b, fc2_w, fc2_b, *, compute_dtype=jnp.bfloat16):
    """Pre-transpose torch-layout (out, in) weights to (in, out) and cast the
    MXU operands to bf16 once, so the per-step forward emits no transposes."""
    return {
        "w1": jnp.asarray(fc1_w).T.astype(compute_dtype),
        "b1": jnp.asarray(fc1_b).reshape(1, -1).astype(jnp.float32),
        "w2": jnp.asarray(fc2_w).T.astype(compute_dtype),
        "b2": jnp.asarray(fc2_b).reshape(1, -1).astype(jnp.float32),
    }


def init_torch_layout_params(key, input_size, hidden_size, num_classes=2):
    """torch.nn.Linear-style init, kept in torch (out, in) layout, f32."""
    k1, k2, k3, k4 = jax.random.split(key, 4)
    b1 = 1.0 / (input_size ** 0.5)
    b2 = 1.0 / (hidden_size ** 0.5)
    fc1_w = jax.random.uniform(k1, (hidden_size, input_size), jnp.float32, -b1, b1)
    fc1_b = jax.random.uniform(k2, (hidden_size,), jnp.float32, -b1, b1)
    fc2_w = jax.random.uniform(k3, (num_classes, hidden_size), jnp.float32, -b2, b2)
    fc2_b = jax.random.uniform(k4, (num_classes,), jnp.float32, -b2, b2)
    return fc1_w, fc1_b, fc2_w, fc2_b


def reference_forward(fc1_w, fc1_b, fc2_w, fc2_b, x):
    """Pure-JAX f32 reference matching the torch module exactly."""
    h = x @ fc1_w.T + fc1_b
    logits = h @ fc2_w.T + fc2_b
    return jax.nn.softmax(logits, axis=-1)      # F.softmax default dim=1 for 2-D


# ------------------------------------ main -----------------------------------

if __name__ == "__main__":
    # Shapes implied by the attack script: input = 10-class posterior vector,
    # small hidden layer, binary (member / non-member) output.
    BATCH, INPUT_SIZE, HIDDEN_SIZE = 8, 10, 64

    key = jax.random.PRNGKey(0)
    k_x, k_p = jax.random.split(key)
    x = jax.random.normal(k_x, (BATCH, INPUT_SIZE), dtype=jnp.float32)

    fc1_w, fc1_b, fc2_w, fc2_b = init_torch_layout_params(
        k_p, INPUT_SIZE, HIDDEN_SIZE)
    params = prepare_params(fc1_w, fc1_b, fc2_w, fc2_b)

    fwd = jax.jit(attack_forward)
    probs = fwd(params, x)
    probs = jax.block_until_ready(probs)

    assert probs.shape == (BATCH, 2), probs.shape
    assert probs.dtype == jnp.float32
    assert bool(jnp.all(jnp.isfinite(probs)))
    # rows are softmax distributions
    assert bool(jnp.allclose(jnp.sum(probs, axis=-1), 1.0, atol=1e-5))
    # matches the f32 reference up to bf16 operand rounding
    ref = reference_forward(fc1_w, fc1_b, fc2_w, fc2_b, x)
    assert bool(jnp.allclose(probs, ref, atol=3e-2, rtol=3e-2))

    print("KERNEL_OK")
</pallas_src>

<mosaic_0001>
module attributes {stable_mosaic.version = 11 : i64} {
  func.func @_attack_fwd_kernel(%arg0: i32, %arg1: memref<8x10xf32, #tpu.memory_space<vmem>>, %arg2: memref<10x64xbf16, #tpu.memory_space<vmem>>, %arg3: memref<1x64xf32, #tpu.memory_space<vmem>>, %arg4: memref<64x2xbf16, #tpu.memory_space<vmem>>, %arg5: memref<1x2xf32, #tpu.memory_space<vmem>>, %arg6: memref<8x2xf32, #tpu.memory_space<vmem>>) attributes {dimension_semantics = [#tpu.dimension_semantics<parallel>], iteration_bounds = array<i64: 1>, scalar_prefetch = 0 : i64, scratch_operands = 0 : i64, tpu.core_type = #tpu.core_type<tc>, window_params = [{transform_indices = @transform_0, window_bounds = array<i64: 8, 10>}, {pipeline_mode = #tpu.pipeline_mode<synchronous>, transform_indices = @transform_1, window_bounds = array<i64: 10, 64>}, {pipeline_mode = #tpu.pipeline_mode<synchronous>, transform_indices = @transform_2, window_bounds = array<i64: 1, 64>}, {pipeline_mode = #tpu.pipeline_mode<synchronous>, transform_indices = @transform_3, window_bounds = array<i64: 64, 2>}, {pipeline_mode = #tpu.pipeline_mode<synchronous>, transform_indices = @transform_4, window_bounds = array<i64: 1, 2>}, {transform_indices = @transform_5, window_bounds = array<i64: 8, 2>}]} {
    %c0 = arith.constant 0 : index
    %c0_0 = arith.constant 0 : index
    %0 = vector.load %arg1[%c0, %c0_0] : memref<8x10xf32, #tpu.memory_space<vmem>>, vector<8x10xf32>
    %1 = arith.truncf %0 : vector<8x10xf32> to vector<8x10xbf16>
    %c0_1 = arith.constant 0 : index
    %c0_2 = arith.constant 0 : index
    %2 = vector.load %arg2[%c0_1, %c0_2] : memref<10x64xbf16, #tpu.memory_space<vmem>>, vector<10x64xbf16>
    %cst = arith.constant dense<0.000000e+00> : vector<8x64xf32>
    %3 = tpu.matmul %1, %2, %cst {dimension_numbers = #tpu.dot_dimension_numbers<[1], [0], [0], [1], [0, 0, 1, 1], [], []>} : vector<8x10xbf16>, vector<10x64xbf16>, vector<8x64xf32> -> vector<8x64xf32>
    %c0_3 = arith.constant 0 : index
    %c0_4 = arith.constant 0 : index
    %4 = vector.load %arg3[%c0_3, %c0_4] : memref<1x64xf32, #tpu.memory_space<vmem>>, vector<1x64xf32>
    %5 = vector.broadcast %4 : vector<1x64xf32> to vector<8x64xf32>
    %6 = arith.addf %3, %5 : vector<8x64xf32>
    %7 = arith.truncf %6 : vector<8x64xf32> to vector<8x64xbf16>
    %c0_5 = arith.constant 0 : index
    %c0_6 = arith.constant 0 : index
    %8 = vector.load %arg4[%c0_5, %c0_6] : memref<64x2xbf16, #tpu.memory_space<vmem>>, vector<64x2xbf16>
    %cst_7 = arith.constant dense<0.000000e+00> : vector<8x2xf32>
    %9 = tpu.matmul %7, %8, %cst_7 {dimension_numbers = #tpu.dot_dimension_numbers<[1], [0], [0], [1], [0, 0, 1, 1], [], []>} : vector<8x64xbf16>, vector<64x2xbf16>, vector<8x2xf32> -> vector<8x2xf32>
    %c0_8 = arith.constant 0 : index
    %c0_9 = arith.constant 0 : index
    %10 = vector.load %arg5[%c0_8, %c0_9] : memref<1x2xf32, #tpu.memory_space<vmem>>, vector<1x2xf32>
    %11 = vector.broadcast %10 : vector<1x2xf32> to vector<8x2xf32>
    %12 = arith.addf %9, %11 : vector<8x2xf32>
    %cst_10 = arith.constant dense<0xFF800000> : vector<8xf32>
    %13 = vector.multi_reduction <maximumf>, %12, %cst_10 [1] : vector<8x2xf32> to vector<8xf32>
    %14 = vector.shape_cast %13 : vector<8xf32> to vector<8x1xf32>
    %15 = vector.broadcast %14 : vector<8x1xf32> to vector<8x2xf32>
    %16 = arith.subf %12, %15 : vector<8x2xf32>
    %17 = math.exp %16 : vector<8x2xf32>
    %cst_11 = arith.constant dense<0.000000e+00> : vector<8xf32>
    %18 = vector.multi_reduction <add>, %17, %cst_11 [1] : vector<8x2xf32> to vector<8xf32>
    %19 = vector.shape_cast %18 : vector<8xf32> to vector<8x1xf32>
    %20 = vector.broadcast %19 : vector<8x1xf32> to vector<8x2xf32>
    %21 = arith.divf %17, %20 : vector<8x2xf32>
    %c0_12 = arith.constant 0 : index
    %c0_13 = arith.constant 0 : index
    %22 = vector.load %arg6[%c0_12, %c0_13] : memref<8x2xf32, #tpu.memory_space<vmem>>, vector<8x2xf32>
    tpu.vector_store %arg6[%c0_12, %c0_13], %21 {strides = array<i32>} : memref<8x2xf32, #tpu.memory_space<vmem>>, vector<8x2xf32>,
    return
  }
  func.func @transform_0(%arg0: i32) -> (i32, i32) {
    %c0_i32 = arith.constant 0 : i32
    %c0_i32_0 = arith.constant 0 : i32
    return %arg0, %c0_i32 : i32, i32
  }
  func.func @transform_1(%arg0: i32) -> (i32, i32) {
    %c0_i32 = arith.constant 0 : i32
    %c0_i32_0 = arith.constant 0 : i32
    %c0_i32_1 = arith.constant 0 : i32
    return %c0_i32, %c0_i32_0 : i32, i32
  }
  func.func @transform_2(%arg0: i32) -> (i32, i32) {
    %c0_i32 = arith.constant 0 : i32
    %c0_i32_0 = arith.constant 0 : i32
    %c0_i32_1 = arith.constant 0 : i32
    return %c0_i32, %c0_i32_0 : i32, i32
  }
  func.func @transform_3(%arg0: i32) -> (i32, i32) {
    %c0_i32 = arith.constant 0 : i32
    %c0_i32_0 = arith.constant 0 : i32
    %c0_i32_1 = arith.constant 0 : i32
    return %c0_i32, %c0_i32_0 : i32, i32
  }
  func.func @transform_4(%arg0: i32) -> (i32, i32) {
    %c0_i32 = arith.constant 0 : i32
    %c0_i32_0 = arith.constant 0 : i32
    %c0_i32_1 = arith.constant 0 : i32
    return %c0_i32, %c0_i32_0 : i32, i32
  }
  func.func @transform_5(%arg0: i32) -> (i32, i32) {
    %c0_i32 = arith.constant 0 : i32
    %c0_i32_0 = arith.constant 0 : i32
    return %arg0, %c0_i32 : i32, i32
  }
}

</mosaic_0001>

<bundles_post_ra>
// kernel: attack_forward.1
= control target key start
LH: loop header
LB: loop body
LE: loop exit
PB: predicated region body
PF: predicated region fallthrough
CT: control target
= control target key end

     0   :  { %vm38_vm0 = vcmask 1044480   ;;  %vm34_vm1 = vcmask 80896   ;;  %vm92_vm2 = vcmask 523264   ;;  %vm109_vm3 = vcmask 15360   ;;  %s235_s1 = inlined_call_operand.vmem [shape: bf16[10,64], index: 1, kind: input, shape index: {}]   ;;  %s236_s0 = inlined_call_operand.vmem [shape: f32[8,10], index: 0, kind: input, shape index: {}]   ;;  %s237_s3 = inlined_call_operand.vmem [shape: bf16[64,2], index: 3, kind: input, shape index: {}]   ;;  %s238_s2 = inlined_call_operand.vmem [shape: f32[1,64], index: 2, kind: input, shape index: {}]   ;;  %s239_s4 = inlined_call_operand.vmem [shape: f32[1,2], index: 4, kind: input, shape index: {}]   ;;  %s240_s5 = inlined_call_operand.vmem [shape: f32[8,2], index: 5, kind: output, shape index: {}]  }
   0x1   :  { %v141_v0 = vld [vmem:[%s235_s1] sm:$0xf]  ;;  %v161_v1 = vld [vmem:[%s235_s1] sm:$0x10]  ;;  %v165_v4 = vld [vmem:[%s237_s3 + $0x18] sm:$0xff] }
   0x2   :  { %v21_v2 = vld [vmem:[%s236_s0] sm:$0xff]  ;;  %v142_v3 = vor.u32 %v161_v1, %v141_v0  ;;  %100 = vmatpush.bf16.msra.mxu1 %v165_v4  ;;  %v164_v7 = vld [vmem:[%s237_s3 + $0x10] sm:$0xff]  ;;  %v163_v8 = vld [vmem:[%s237_s3 + $0x8] sm:$0xff] }
   0x3   :  { %v22_v6 = vpack.c.bf16 %v21_v2, %v21_v2  ;;  %v162_v9 = vld [vmem:[%s237_s3] sm:$0xff] }
   0x4   :  { %v40_v5 = vsel %vm38_vm0, %v142_v3, 0  ;;  %v166_v10 = vld [vmem:[%s238_s2] ss:$0 sm:$0xff] }
   0x5   :  { %49 = vmatpush.bf16.msra.mxu0 %v40_v5  ;;  %v167_v15 = vld [vmem:[%s239_s4] ss:$0 sm:$0xff] }
   0x6   :  { %101 = vmatpush.bf16.msra.mxu1 %v164_v7 }
   0x8   :  { %143 = vmatmul.msk.bf16.vlgmr.msra.gmra.mxu0 %vm34_vm1, %v22_v6 }
   0xa   :  { %102 = vmatpush.bf16.msra.mxu1 %v163_v8 }
   0xe   :  { %103 = vmatpush.bf16.msra.mxu1 %v162_v9 }
  0x85   :  { %v51_v11 = vpop.f32.mrf.mxu0 }
  0x86   :  { %v52_v12 = vadd.f32 %v166_v10, %v51_v11 }
  0x88   :  { %v55_v13 = vpack.c.bf16 %v52_v12, %v52_v12 }
  0x8a   :  { %160 = vmatmul.msk.bf16.vlgmr.msra.gmra.mxu1 %vm92_vm2, %v55_v13 }
  0x8d   :  { %v53_v14 = vpop.f32.mrf.mxu0 }
 0x107   :  { %v105_v16 = vpop.f32.mrf.mxu1 }
 0x108   :  { %v106_v17 = vadd.f32 %v167_v15, %v105_v16 }
 0x10a   :  { %v110_v18 = vsel %vm109_vm3, %v106_v17, -inf }
 0x10b   :  { %111 = vmax.xlane.f32.xlu0 %v110_v18 }
 0x10f   :  { %v107_v19 = vpop.f32.mrf.mxu1 }
 0x17e   :  { %v112_v20 = vpop.xlane.xlu0 %111 }
 0x17f   :  { %v113_v21 = vsub.f32 %v106_v17, %v112_v20 }
 0x181   :  { %v114_v22 = vmul.f32 1.442695, %v113_v21 }
 0x183   :  { %168 = vpow2.f32 %v114_v22 }
 0x189   :  { %v169_v23 = vpop.eup %168 }
 0x18a   :  { %v116_v24 = vsel %vm109_vm3, %v169_v23, 0.0 }
 0x18b   :  { %117 = vadd.xlane.f32.xlu0 %v116_v24 }
 0x1fe   :  { %v118_v25 = vpop.xlane.xlu0 %117 }
 0x1ff   :  { %170 = vrcp.f32 %v118_v25  ;;  %v130_v29 = vand.u32 2147483648, %v118_v25  ;;  %v128_v31 = vand.u32 2147483647, %v118_v25  ;;  %vm124_vm5 = vweird.f32 %v118_v25 }
 0x201   :  { %v131_v33 = vor.u32 1.1754944e-38, %v130_v29  ;;  %vm129_vm7 = vcmp.eq.f32.partialorder %v128_v31, 8.507059e+37 }
 0x205   :  { %v171_v26 = vpop.eup %170 }
 0x206   :  { %v120_v27 = vmul.f32 %v171_v26, %v118_v25  ;;  %vm125_vm4 = vweird.f32 %v171_v26 }
 0x207   :  { %vm126_vm6 = vmor %vm124_vm5, %vm125_vm4 }
 0x208   :  { %v121_v28 = vsub.f32 1.0, %v120_v27 }
 0x20a   :  { %v122_v30 = vmul.f32 %v171_v26, %v121_v28 }
 0x20c   :  { %v123_v32 = vadd.f32 %v171_v26, %v122_v30 }
 0x20e   :  { %v127_v34 = vsel %vm126_vm6, %v171_v26, %v123_v32 }
 0x20f   :  { %v132_v35 = vsel %vm129_vm7, %v131_v33, %v127_v34 }
 0x210   :  { %v133_v36 = vmul.f32 %v169_v23, %v132_v35 }
 0x212   :  { %134 = vst.msk [vmem:[%s240_s5] sm:$0xff] %vm109_vm3, %v133_v36 }

</bundles_post_ra>
